<compile_context>
chip_gen: v7x
topology: tpu7x:2x2x1
jax: 0.10.0
libtpu: 0.0.40
codegen_flags: <defaults>
</compile_context>

<pallas_src>
import jax
import jax.numpy as jnp
from jax.experimental import pallas as pl
from jax.experimental.pallas import tpu as pltpu

LEAKY_SLOPE = 0.01   # nn.LeakyReLU default
BN_EPS = 1e-5        # nn.BatchNorm1d default
LANE = 128           # TPU lane width


def _leaky(h):
    # max(h, slope*h) == LeakyReLU for 0 < slope < 1 (2 VALU ops vs 3 for where)
    return jnp.maximum(h, LEAKY_SLOPE * h)


def _resident(shape):
    """Full-array block whose index never changes across the grid -> stays in VMEM."""
    nd = len(shape)
    return pl.BlockSpec(shape, lambda *_: (0,) * nd)


def _round_up(v, m):
    return ((v + m - 1) // m) * m


def _vmem_budget_bytes():
    """Generation-aware VMEM budget (v5e/v6e: 128 MiB phys, v7x: 64 MiB)."""
    try:
        cap = int(pltpu.get_tpu_info().vmem_capacity_bytes)
    except Exception:
        cap = 64 << 20                      # conservative v7x fallback
    return max(32 << 20, min(cap * 3 // 4, 96 << 20))


def _mlp_front(x, w1, b1, w2, b2, w3, b3, w4, b4, dot_dtype):
    """Layers 1-4 (through the last pre-BN Linear). MXU operands in dot_dtype,
    f32 accumulation; biases / activations stay f32."""
    h = _leaky(jnp.dot(x.astype(dot_dtype), w1,
                       preferred_element_type=jnp.float32) + b1)
    h = _leaky(jnp.dot(h.astype(dot_dtype), w2,
                       preferred_element_type=jnp.float32) + b2)
    h = _leaky(jnp.dot(h.astype(dot_dtype), w3,
                       preferred_element_type=jnp.float32) + b3)
    h = jnp.dot(h.astype(dot_dtype), w4,
                preferred_element_type=jnp.float32) + b4
    return h


# ----------------------------------------------------------------------------
# Path 1: whole MLP in a single block (full batch resident in VMEM)
# ----------------------------------------------------------------------------
def _make_fused_kernel(dot_dtype):
    def fused_kernel(x_ref,
                     w1_ref, b1_ref, w2_ref, b2_ref, w3_ref, b3_ref,
                     w4_ref, b4_ref, gamma_ref, beta_ref, w5_ref, b5_ref,
                     o_ref):
        h = _mlp_front(x_ref[...],
                       w1_ref[...], b1_ref[...], w2_ref[...], b2_ref[...],
                       w3_ref[...], b3_ref[...], w4_ref[...], b4_ref[...],
                       dot_dtype)

        # BatchNorm1d (training mode, biased variance).  Full batch is resident,
        # so use the numerically-stable mean-subtracted variance (matches torch).
        inv_n = 1.0 / h.shape[0]
        mean = jnp.sum(h, axis=0, keepdims=True) * inv_n
        d = h - mean
        var = jnp.sum(d * d, axis=0, keepdims=True) * inv_n
        scale = gamma_ref[...] * jax.lax.rsqrt(var + BN_EPS)
        shift = beta_ref[...] - mean * scale

        h = _leaky(h * scale + shift)
        o_ref[...] = jnp.dot(h.astype(dot_dtype), w5_ref[...],
                             preferred_element_type=jnp.float32) + b5_ref[...]
    return fused_kernel


# ----------------------------------------------------------------------------
# Path 2: batch-tiled, two-pass (correct full-batch BN statistics, no h4 spill)
# ----------------------------------------------------------------------------
def _make_stats_kernel(batch_rows, tile_rows, ntiles, dot_dtype):
    """Pass 1: layers 1-4 per batch tile, emit per-tile partial BN statistics."""
    rows_in_last = batch_rows - (ntiles - 1) * tile_rows
    need_mask = rows_in_last != tile_rows

    def stats_kernel(x_ref, w1_ref, b1_ref, w2_ref, b2_ref, w3_ref, b3_ref,
                     w4_ref, b4_ref, psum_ref, psq_ref):
        h = _mlp_front(x_ref[...],
                       w1_ref[...], b1_ref[...], w2_ref[...], b2_ref[...],
                       w3_ref[...], b3_ref[...], w4_ref[...], b4_ref[...],
                       dot_dtype)

        # Full-tile statistics (no masking cost on interior tiles).
        psum_ref[...] = jnp.sum(h, axis=0, keepdims=True)[None]
        psq_ref[...] = jnp.sum(h * h, axis=0, keepdims=True)[None]

        if need_mask:
            # Only the final (partial) tile pays the iota+where, gated at runtime.
            @pl.when(pl.program_id(0) == ntiles - 1)
            def _():
                rows = jax.lax.broadcasted_iota(jnp.int32, (tile_rows, 1), 0)
                hm = jnp.where(rows < rows_in_last, h, 0.0)
                psum_ref[...] = jnp.sum(hm, axis=0, keepdims=True)[None]
                psq_ref[...] = jnp.sum(hm * hm, axis=0, keepdims=True)[None]

    return stats_kernel


def _make_back_kernel(dot_dtype):
    """Pass 2: recompute layers 1-4 (cheap, weights resident), apply global BN
    affine + LeakyReLU + final Linear.  Eliminates the h4 HBM round trip."""
    def back_kernel(x_ref, w1_ref, b1_ref, w2_ref, b2_ref, w3_ref, b3_ref,
                    w4_ref, b4_ref, scale_ref, shift_ref, w5_ref, b5_ref,
                    o_ref):
        h = _mlp_front(x_ref[...],
                       w1_ref[...], b1_ref[...], w2_ref[...], b2_ref[...],
                       w3_ref[...], b3_ref[...], w4_ref[...], b4_ref[...],
                       dot_dtype)
        h = _leaky(h * scale_ref[...] + shift_ref[...])
        o_ref[...] = jnp.dot(h.astype(dot_dtype), w5_ref[...],
                             preferred_element_type=jnp.float32) + b5_ref[...]
    return back_kernel


# ----------------------------------------------------------------------------
# Wrapper
# ----------------------------------------------------------------------------
def network_forward(x, params, *, tile_rows=2048, single_block_max=None,
                    dot_dtype=jnp.bfloat16):
    """x: (B, inChannels) float32; params: dict of weights/biases.

    dot_dtype: MXU operand dtype (bf16 is native on v5e/v6e/v7x MXUs; f32
    accumulation is always used).  Pass jnp.float32 for bit-tighter numerics.
    """
    x = x.astype(jnp.float32)
    B, in_c = x.shape
    out_c = params["w5"].shape[1]
    f4 = params["w4"].shape[1]                        # outChannels * 8 (BN width)

    vmem_budget = _vmem_budget_bytes()

    # Per-row live-VMEM estimate: every activation width lane-pads to 128;
    # f32 worst case, x2 slack for compiler temporaries.
    feat = (in_c, 16 * in_c, 8 * in_c, 16 * out_c, 8 * out_c, out_c)
    row_bytes = 2 * 4 * sum(_round_up(f, LANE) for f in feat)

    if single_block_max is None:
        # Keep half the budget for weights / headroom; cap so very large batches
        # still use the parallel (two-TC on v7x) tiled path.
        single_block_max = max(8, min(8192, (vmem_budget // 2) // row_bytes))

    # Weights in MXU dtype (halves residency for bf16); biases / BN params f32.
    w = {k: params[k].astype(dot_dtype) for k in ("w1", "w2", "w3", "w4", "w5")}
    b = {k: params[k].astype(jnp.float32) for k in ("b1", "b2", "b3", "b4", "b5")}
    gamma = params["gamma"].astype(jnp.float32)
    beta = params["beta"].astype(jnp.float32)

    if B <= single_block_max:
        # --- single fused kernel: everything resident in VMEM ------------------
        vmem = pl.BlockSpec(memory_space=pltpu.MemorySpace.VMEM)
        args = (x,
                w["w1"], b["b1"], w["w2"], b["b2"], w["w3"], b["b3"],
                w["w4"], b["b4"], gamma, beta, w["w5"], b["b5"])
        # Output written unpadded: block last dim == full array dim (allowed),
        # avoids inflating output HBM traffic when out_c << 128.
        return pl.pallas_call(
            _make_fused_kernel(dot_dtype),
            out_shape=jax.ShapeDtypeStruct((B, out_c), jnp.float32),
            in_specs=[vmem] * len(args),
            out_specs=vmem,
            compiler_params=pltpu.CompilerParams(vmem_limit_bytes=vmem_budget),
        )(*args)

    # --- batch-tiled two-pass path (stats-only pass 1, recompute in pass 2) ----
    tb = max(8, min(tile_rows - tile_rows % 8, _round_up(B, 8)))
    tb_cap = max(8, ((vmem_budget // (3 * row_bytes)) // 8) * 8)   # pipelining slack
    tb = min(tb, tb_cap)
    ntiles = -(-B // tb)
    Bp = ntiles * tb
    xp = jnp.pad(x, ((0, Bp - B), (0, 0))) if Bp != B else x

    weight_args = (w["w1"], b["b1"], w["w2"], b["b2"],
                   w["w3"], b["b3"], w["w4"], b["b4"])
    weight_specs = [_resident(a.shape) for a in weight_args]
    cp_tiled = pltpu.CompilerParams(dimension_semantics=("parallel",),
                                    vmem_limit_bytes=vmem_budget)

    # Pass 1: per-tile partial BN statistics (batch axis "parallel").
    psum, psq = pl.pallas_call(
        _make_stats_kernel(B, tb, ntiles, dot_dtype),
        out_shape=(jax.ShapeDtypeStruct((ntiles, 1, f4), jnp.float32),
                   jax.ShapeDtypeStruct((ntiles, 1, f4), jnp.float32)),
        grid=(ntiles,),
        in_specs=[pl.BlockSpec((tb, in_c), lambda i: (i, 0))] + weight_specs,
        out_specs=(pl.BlockSpec((1, 1, f4), lambda i: (i, 0, 0)),
                   pl.BlockSpec((1, 1, f4), lambda i: (i, 0, 0))),
        compiler_params=cp_tiled,
    )(xp, *weight_args)

    # Tiny XLA reduction: global BN affine from partial sums (full-batch stats).
    n = jnp.float32(B)
    mean = jnp.sum(psum, axis=0) / n                  # (1, f4)
    ex2 = jnp.sum(psq, axis=0) / n
    # TODO(synk): one-pass E[h^2]-mean^2 can cancel for strongly off-center h;
    # sums are kept in f32 which is adequate for these activation scales.
    var = ex2 - mean * mean                           # biased variance
    scale = gamma * jax.lax.rsqrt(var + BN_EPS)
    shift = beta - mean * scale

    # Pass 2: recompute layers 1-4, BN affine + LeakyReLU + final Linear.
    out = pl.pallas_call(
        _make_back_kernel(dot_dtype),
        out_shape=jax.ShapeDtypeStruct((Bp, out_c), jnp.float32),
        grid=(ntiles,),
        in_specs=[pl.BlockSpec((tb, in_c), lambda i: (i, 0))] + weight_specs +
                 [_resident(scale.shape), _resident(shift.shape),
                  _resident(w["w5"].shape), _resident(b["b5"].shape)],
        out_specs=pl.BlockSpec((tb, out_c), lambda i: (i, 0)),
        compiler_params=cp_tiled,
    )(xp, *weight_args, scale, shift, w["w5"], b["b5"])

    return out[:B]


# ----------------------------------------------------------------------------
# Params / reference
# ----------------------------------------------------------------------------
def init_params(key, in_channels, out_channels):
    """Deterministic init mimicking PyTorch default (uniform +/- 1/sqrt(fan_in))."""
    dims = [
        (in_channels, in_channels * 16),
        (in_channels * 16, in_channels * 8),
        (in_channels * 8, out_channels * 16),
        (out_channels * 16, out_channels * 8),
        (out_channels * 8, out_channels),
    ]
    params = {}
    for i, (fan_in, fan_out) in enumerate(dims, start=1):
        key, kw, kb = jax.random.split(key, 3)
        bound = 1.0 / jnp.sqrt(float(fan_in))
        params[f"w{i}"] = jax.random.uniform(
            kw, (fan_in, fan_out), jnp.float32, -bound, bound)
        # biases kept 2D (1, fan_out) for clean lane-wise broadcast in the kernel
        params[f"b{i}"] = jax.random.uniform(
            kb, (1, fan_out), jnp.float32, -bound, bound)
    bn_features = out_channels * 8
    params["gamma"] = jnp.ones((1, bn_features), jnp.float32)
    params["beta"] = jnp.zeros((1, bn_features), jnp.float32)
    return params


def reference_forward(x, params, dot_dtype=jnp.float32):
    """Pure-JAX reference (training-mode BatchNorm with batch statistics)."""
    def lin(a, w, b):
        return jnp.dot(a.astype(dot_dtype), w.astype(dot_dtype),
                       preferred_element_type=jnp.float32) + b
    h = _leaky(lin(x, params["w1"], params["b1"]))
    h = _leaky(lin(h, params["w2"], params["b2"]))
    h = _leaky(lin(h, params["w3"], params["b3"]))
    h = lin(h, params["w4"], params["b4"])
    mean = jnp.mean(h, axis=0, keepdims=True)
    var = jnp.mean((h - mean) ** 2, axis=0, keepdims=True)
    h = (h - mean) * jax.lax.rsqrt(var + BN_EPS) * params["gamma"] + params["beta"]
    h = _leaky(h)
    return lin(h, params["w5"], params["b5"])


if __name__ == "__main__":
    in_channels = 4
    out_channels = 4

    key = jax.random.PRNGKey(0)
    key, kx_small, kx_big = jax.random.split(key, 3)
    params = init_params(key, in_channels, out_channels)

    # 1) Small batch -> fused single-block path, f32 MXU operands, tight tol.
    batch_small = 8
    x_small = jax.random.normal(kx_small, (batch_small, in_channels), jnp.float32)
    out_small = jax.block_until_ready(
        network_forward(x_small, params, dot_dtype=jnp.float32))
    ref_small = reference_forward(x_small, params)
    assert out_small.shape == (batch_small, out_channels)
    assert jnp.allclose(out_small, ref_small, atol=1e-3, rtol=1e-3), \
        "fused path mismatch vs JAX reference"

    # 2) Larger batch -> batch-tiled two-pass path (grid, partial-tile masking),
    #    f32 MXU operands, tight tol.
    batch_big = 200
    x_big = jax.random.normal(kx_big, (batch_big, in_channels), jnp.float32)
    out_big = jax.block_until_ready(
        network_forward(x_big, params, tile_rows=128, single_block_max=0,
                        dot_dtype=jnp.float32))
    ref_big = reference_forward(x_big, params)
    assert out_big.shape == (batch_big, out_channels)
    assert jnp.allclose(out_big, ref_big, atol=1e-3, rtol=1e-3), \
        "tiled two-pass path mismatch vs JAX reference"

    # 3) Default performance config (bf16 MXU operands, f32 accumulation) on the
    #    tiled path, compared against a matching bf16-operand reference.
    out_bf16 = jax.block_until_ready(
        network_forward(x_big, params, tile_rows=128, single_block_max=0))
    ref_bf16 = reference_forward(x_big, params, dot_dtype=jnp.bfloat16)
    assert out_bf16.shape == (batch_big, out_channels)
    assert jnp.allclose(out_bf16, ref_bf16, atol=1e-2, rtol=1e-2), \
        "bf16-operand tiled path mismatch vs bf16 JAX reference"

    print("KERNEL_OK")
</pallas_src>

<mosaic_0001>
module attributes {stable_mosaic.version = 11 : i64} {
  func.func @fused_kernel(%arg0: memref<8x4xf32, #tpu.memory_space<vmem>>, %arg1: memref<4x64xf32, #tpu.memory_space<vmem>>, %arg2: memref<1x64xf32, #tpu.memory_space<vmem>>, %arg3: memref<64x32xf32, #tpu.memory_space<vmem>>, %arg4: memref<1x32xf32, #tpu.memory_space<vmem>>, %arg5: memref<32x64xf32, #tpu.memory_space<vmem>>, %arg6: memref<1x64xf32, #tpu.memory_space<vmem>>, %arg7: memref<64x32xf32, #tpu.memory_space<vmem>>, %arg8: memref<1x32xf32, #tpu.memory_space<vmem>>, %arg9: memref<1x32xf32, #tpu.memory_space<vmem>>, %arg10: memref<1x32xf32, #tpu.memory_space<vmem>>, %arg11: memref<32x4xf32, #tpu.memory_space<vmem>>, %arg12: memref<1x4xf32, #tpu.memory_space<vmem>>, %arg13: memref<8x4xf32, #tpu.memory_space<vmem>>) attributes {dimension_semantics = [], scalar_prefetch = 0 : i64, scratch_operands = 0 : i64, tpu.core_type = #tpu.core_type<tc>} {
    %c0 = arith.constant 0 : index
    %c0_0 = arith.constant 0 : index
    %0 = vector.load %arg0[%c0, %c0_0] : memref<8x4xf32, #tpu.memory_space<vmem>>, vector<8x4xf32>
    %c0_1 = arith.constant 0 : index
    %c0_2 = arith.constant 0 : index
    %1 = vector.load %arg1[%c0_1, %c0_2] : memref<4x64xf32, #tpu.memory_space<vmem>>, vector<4x64xf32>
    %c0_3 = arith.constant 0 : index
    %c0_4 = arith.constant 0 : index
    %2 = vector.load %arg2[%c0_3, %c0_4] : memref<1x64xf32, #tpu.memory_space<vmem>>, vector<1x64xf32>
    %c0_5 = arith.constant 0 : index
    %c0_6 = arith.constant 0 : index
    %3 = vector.load %arg3[%c0_5, %c0_6] : memref<64x32xf32, #tpu.memory_space<vmem>>, vector<64x32xf32>
    %c0_7 = arith.constant 0 : index
    %c0_8 = arith.constant 0 : index
    %4 = vector.load %arg4[%c0_7, %c0_8] : memref<1x32xf32, #tpu.memory_space<vmem>>, vector<1x32xf32>
    %c0_9 = arith.constant 0 : index
    %c0_10 = arith.constant 0 : index
    %5 = vector.load %arg5[%c0_9, %c0_10] : memref<32x64xf32, #tpu.memory_space<vmem>>, vector<32x64xf32>
    %c0_11 = arith.constant 0 : index
    %c0_12 = arith.constant 0 : index
    %6 = vector.load %arg6[%c0_11, %c0_12] : memref<1x64xf32, #tpu.memory_space<vmem>>, vector<1x64xf32>
    %c0_13 = arith.constant 0 : index
    %c0_14 = arith.constant 0 : index
    %7 = vector.load %arg7[%c0_13, %c0_14] : memref<64x32xf32, #tpu.memory_space<vmem>>, vector<64x32xf32>
    %c0_15 = arith.constant 0 : index
    %c0_16 = arith.constant 0 : index
    %8 = vector.load %arg8[%c0_15, %c0_16] : memref<1x32xf32, #tpu.memory_space<vmem>>, vector<1x32xf32>
    %cst = arith.constant dense<0.000000e+00> : vector<8x64xf32>
    %9 = tpu.matmul %0, %1, %cst {dimension_numbers = #tpu.dot_dimension_numbers<[1], [0], [0], [1], [0, 0, 1, 1], [], []>} : vector<8x4xf32>, vector<4x64xf32>, vector<8x64xf32> -> vector<8x64xf32>
    %10 = vector.broadcast %2 : vector<1x64xf32> to vector<8x64xf32>
    %11 = arith.addf %9, %10 : vector<8x64xf32>
    %cst_17 = arith.constant 0.00999999977 : f32
    %12 = vector.broadcast %cst_17 : f32 to vector<8x64xf32>
    %13 = arith.mulf %12, %11 : vector<8x64xf32>
    %14 = arith.maximumf %11, %13 : vector<8x64xf32>
    %cst_18 = arith.constant dense<0.000000e+00> : vector<8x32xf32>
    %15 = tpu.matmul %14, %3, %cst_18 {dimension_numbers = #tpu.dot_dimension_numbers<[1], [0], [0], [1], [0, 0, 1, 1], [], []>} : vector<8x64xf32>, vector<64x32xf32>, vector<8x32xf32> -> vector<8x32xf32>
    %16 = vector.broadcast %4 : vector<1x32xf32> to vector<8x32xf32>
    %17 = arith.addf %15, %16 : vector<8x32xf32>
    %cst_19 = arith.constant 0.00999999977 : f32
    %18 = vector.broadcast %cst_19 : f32 to vector<8x32xf32>
    %19 = arith.mulf %18, %17 : vector<8x32xf32>
    %20 = arith.maximumf %17, %19 : vector<8x32xf32>
    %cst_20 = arith.constant dense<0.000000e+00> : vector<8x64xf32>
    %21 = tpu.matmul %20, %5, %cst_20 {dimension_numbers = #tpu.dot_dimension_numbers<[1], [0], [0], [1], [0, 0, 1, 1], [], []>} : vector<8x32xf32>, vector<32x64xf32>, vector<8x64xf32> -> vector<8x64xf32>
    %22 = vector.broadcast %6 : vector<1x64xf32> to vector<8x64xf32>
    %23 = arith.addf %21, %22 : vector<8x64xf32>
    %cst_21 = arith.constant 0.00999999977 : f32
    %24 = vector.broadcast %cst_21 : f32 to vector<8x64xf32>
    %25 = arith.mulf %24, %23 : vector<8x64xf32>
    %26 = arith.maximumf %23, %25 : vector<8x64xf32>
    %cst_22 = arith.constant dense<0.000000e+00> : vector<8x32xf32>
    %27 = tpu.matmul %26, %7, %cst_22 {dimension_numbers = #tpu.dot_dimension_numbers<[1], [0], [0], [1], [0, 0, 1, 1], [], []>} : vector<8x64xf32>, vector<64x32xf32>, vector<8x32xf32> -> vector<8x32xf32>
    %28 = vector.broadcast %8 : vector<1x32xf32> to vector<8x32xf32>
    %29 = arith.addf %27, %28 : vector<8x32xf32>
    %cst_23 = arith.constant dense<0.000000e+00> : vector<32xf32>
    %30 = vector.multi_reduction <add>, %29, %cst_23 [0] : vector<8x32xf32> to vector<32xf32>
    %31 = vector.shape_cast %30 : vector<32xf32> to vector<1x32xf32>
    %cst_24 = arith.constant 1.250000e-01 : f32
    %32 = vector.broadcast %cst_24 : f32 to vector<1x32xf32>
    %33 = arith.mulf %31, %32 : vector<1x32xf32>
    %34 = vector.broadcast %33 : vector<1x32xf32> to vector<8x32xf32>
    %35 = arith.subf %29, %34 : vector<8x32xf32>
    %36 = arith.mulf %35, %35 : vector<8x32xf32>
    %cst_25 = arith.constant dense<0.000000e+00> : vector<32xf32>
    %37 = vector.multi_reduction <add>, %36, %cst_25 [0] : vector<8x32xf32> to vector<32xf32>
    %38 = vector.shape_cast %37 : vector<32xf32> to vector<1x32xf32>
    %cst_26 = arith.constant 1.250000e-01 : f32
    %39 = vector.broadcast %cst_26 : f32 to vector<1x32xf32>
    %40 = arith.mulf %38, %39 : vector<1x32xf32>
    %c0_27 = arith.constant 0 : index
    %c0_28 = arith.constant 0 : index
    %41 = vector.load %arg9[%c0_27, %c0_28] : memref<1x32xf32, #tpu.memory_space<vmem>>, vector<1x32xf32>
    %cst_29 = arith.constant 9.99999974E-6 : f32
    %42 = vector.broadcast %cst_29 : f32 to vector<1x32xf32>
    %43 = arith.addf %40, %42 : vector<1x32xf32>
    %44 = math.rsqrt %43 : vector<1x32xf32>
    %45 = arith.mulf %41, %44 : vector<1x32xf32>
    %c0_30 = arith.constant 0 : index
    %c0_31 = arith.constant 0 : index
    %46 = vector.load %arg10[%c0_30, %c0_31] : memref<1x32xf32, #tpu.memory_space<vmem>>, vector<1x32xf32>
    %47 = arith.mulf %33, %45 : vector<1x32xf32>
    %48 = arith.subf %46, %47 : vector<1x32xf32>
    %49 = vector.broadcast %45 : vector<1x32xf32> to vector<8x32xf32>
    %50 = arith.mulf %29, %49 : vector<8x32xf32>
    %51 = vector.broadcast %48 : vector<1x32xf32> to vector<8x32xf32>
    %52 = arith.addf %50, %51 : vector<8x32xf32>
    %cst_32 = arith.constant 0.00999999977 : f32
    %53 = vector.broadcast %cst_32 : f32 to vector<8x32xf32>
    %54 = arith.mulf %53, %52 : vector<8x32xf32>
    %55 = arith.maximumf %52, %54 : vector<8x32xf32>
    %c0_33 = arith.constant 0 : index
    %c0_34 = arith.constant 0 : index
    %56 = vector.load %arg11[%c0_33, %c0_34] : memref<32x4xf32, #tpu.memory_space<vmem>>, vector<32x4xf32>
    %cst_35 = arith.constant dense<0.000000e+00> : vector<8x4xf32>
    %57 = tpu.matmul %55, %56, %cst_35 {dimension_numbers = #tpu.dot_dimension_numbers<[1], [0], [0], [1], [0, 0, 1, 1], [], []>} : vector<8x32xf32>, vector<32x4xf32>, vector<8x4xf32> -> vector<8x4xf32>
    %c0_36 = arith.constant 0 : index
    %c0_37 = arith.constant 0 : index
    %58 = vector.load %arg12[%c0_36, %c0_37] : memref<1x4xf32, #tpu.memory_space<vmem>>, vector<1x4xf32>
    %59 = vector.broadcast %58 : vector<1x4xf32> to vector<8x4xf32>
    %60 = arith.addf %57, %59 : vector<8x4xf32>
    %c0_38 = arith.constant 0 : index
    %c0_39 = arith.constant 0 : index
    %61 = vector.load %arg13[%c0_38, %c0_39] : memref<8x4xf32, #tpu.memory_space<vmem>>, vector<8x4xf32>
    tpu.vector_store %arg13[%c0_38, %c0_39], %60 {strides = array<i32>} : memref<8x4xf32, #tpu.memory_space<vmem>>, vector<8x4xf32>,
    return
  }
}

</mosaic_0001>

<bundles_post_ra>
// kernel: tpu_custom_call.1
= control target key start
LH: loop header
LB: loop body
LE: loop exit
PB: predicated region body
PF: predicated region fallthrough
CT: control target
= control target key end

     0   :  { %vm80_vm0 = vcmask 1043456   ;;  %vm76_vm1 = vcmask 31744   ;;  %v676_v0 = vmov 0.0   ;;  %vm677_vm2 = vmmov 0   ;;  %s882_s1 = inlined_call_operand.vmem [shape: f32[4,64], index: 1, kind: input, shape index: {}]   ;;  %s883_s0 = inlined_call_operand.vmem [shape: f32[8,4], index: 0, kind: input, shape index: {}]   ;;  %s884_s3 = inlined_call_operand.vmem [shape: f32[64,32], index: 3, kind: input, shape index: {}]   ;;  %s885_s2 = inlined_call_operand.vmem [shape: f32[1,64], index: 2, kind: input, shape index: {}]   ;;  %s886_s5 = inlined_call_operand.vmem [shape: f32[32,64], index: 5, kind: input, shape index: {}]   ;;  %s887_s4 = inlined_call_operand.vmem [shape: f32[1,32], index: 4, kind: input, shape index: {}]   ;;  %s888_s7 = inlined_call_operand.vmem [shape: f32[64,32], index: 7, kind: input, shape index: {}]   ;;  %s889_s6 = inlined_call_operand.vmem [shape: f32[1,64], index: 6, kind: input, shape index: {}]   ;;  %s890_s11 = inlined_call_operand.vmem [shape: f32[32,4], index: 11, kind: input, shape index: {}]   ;;  %s891_s8 = inlined_call_operand.vmem [shape: f32[1,32], index: 8, kind: input, shape index: {}]   ;;  %s892_s9 = inlined_call_operand.vmem [shape: f32[1,32], index: 9, kind: input, shape index: {}]   ;;  %s893_s10 = inlined_call_operand.vmem [shape: f32[1,32], index: 10, kind: input, shape index: {}]   ;;  %s894_s12 = inlined_call_operand.vmem [shape: f32[1,4], index: 12, kind: input, shape index: {}]   ;;  %s895_s13 = inlined_call_operand.vmem [shape: f32[8,4], index: 13, kind: output, shape index: {}]  }
   0x1   :  { %570 = vmatprep.subr.mxu0 %v676_v0  ;;  %v45_v1 = vld [vmem:[%s882_s1] sm:$0xf]  ;;  %572 = vmatprep.mubr.msk.f32.mxu0 %vm677_vm2, %v676_v0  ;;  %v678_v4 = vmov 0.0|0.0   ;;  %v48_v5 = vld [vmem:[%s884_s3 + $0x8] sm:$0xff]  ;;  %v49_v6 = vld [vmem:[%s884_s3 + $0x10] sm:$0xff]  ;;  %vm162_vm3 = vcmask 523264  }
   0x2   :  { %v44_v2 = vld [vmem:[%s883_s0] sm:$0xff]  ;;  %571 = vmatpush3.msk.msra.mxu0 %vm80_vm0, %v45_v1  ;;  %635 = vmatprep.subr.bf16.mxu1 %v678_v4  ;;  %v50_v7 = vld [vmem:[%s884_s3 + $0x18] sm:$0xff]  ;;  %v52_v11 = vld [vmem:[%s884_s3 + $0x28] sm:$0xff]  ;;  %vm244_vm4 = vcmask 261120  }
   0x3   :  { %v47_v3 = vld [vmem:[%s884_s3] sm:$0xff]  ;;  %573 = vmatmul.mubr.msk.f32.vlgmr.msra.gmra.mrb[0].mxu0 %vm76_vm1, %v44_v2  ;;  %591 = vmatprep.mubr.msk.f32.mxu1 %vm677_vm2, %v676_v0  ;;  %v639_v9 = vpack.c.bf16 %v50_v7, %v49_v6  ;;  %v53_v13 = vld [vmem:[%s884_s3 + $0x30] sm:$0xff]  ;;  %v54_v14 = vld [vmem:[%s884_s3 + $0x38] sm:$0xff] }
   0x4   :  { %v636_v8 = vpack.c.bf16 %v48_v5, %v47_v3  ;;  %647 = vmatprep.subr.bf16.mxu0 %v678_v4  ;;  %602 = vmatprep.mubr.msk.f32.mxu0 %vm677_vm2, %v676_v0  ;;  %v51_v10 = vld [vmem:[%s884_s3 + $0x20] sm:$0xff]  ;;  %v645_v15 = vpack.c.bf16 %v54_v14, %v53_v13  ;;  %v57_v23 = vld [vmem:[%s886_s5 + $0x8] sm:$0xff]  ;;  %v58_v25 = vld [vmem:[%s886_s5 + $0x10] sm:$0xff] }
   0x5   :  { %v642_v12 = vpack.c.bf16 %v52_v11, %v51_v10  ;;  %v529_v16 = vld [vmem:[%s885_s2] ss:$0 sm:$0xff]  ;;  %v59_v26 = vld [vmem:[%s886_s5 + $0x18] sm:$0xff]  ;;  %v62_v33 = vld [vmem:[%s888_s7 + $0x8] sm:$0xff] }
   0x6   :  { %637 = vmatpush3.bf16.msra.mxu1 %v636_v8  ;;  %v56_v22 = vld [vmem:[%s886_s5] sm:$0xff]  ;;  %v651_v27 = vpack.c.bf16 %v59_v26, %v58_v25  ;;  %v63_v37 = vld [vmem:[%s888_s7 + $0x10] sm:$0xff]  ;;  %v64_v38 = vld [vmem:[%s888_s7 + $0x18] sm:$0xff] }
   0x7   :  { %638 = vmatprep.subr.bf16.mxu1 %v678_v4  ;;  %v648_v24 = vpack.c.bf16 %v57_v23, %v56_v22  ;;  %v532_v28 = vld [vmem:[%s887_s4] ss:$0 sm:$0xff]  ;;  %v657_v39 = vpack.c.bf16 %v64_v38, %v63_v37  ;;  %v66_v41 = vld [vmem:[%s888_s7 + $0x28] sm:$0xff]  ;;  %v67_v43 = vld [vmem:[%s888_s7 + $0x30] sm:$0xff] }
   0x8   :  { %v61_v32 = vld [vmem:[%s888_s7] sm:$0xff]  ;;  %v68_v44 = vld [vmem:[%s888_s7 + $0x38] sm:$0xff]  ;;  %v441_v53 = vld [vmem:[%s890_s11 + $0x8] sm:$0xff] }
   0x9   :  { %649 = vmatpush3.bf16.msra.mxu0 %v648_v24  ;;  %v654_v35 = vpack.c.bf16 %v62_v33, %v61_v32  ;;  %v65_v40 = vld [vmem:[%s888_s7 + $0x20] sm:$0xff]  ;;  %v663_v45 = vpack.c.bf16 %v68_v44, %v67_v43  ;;  %v442_v55 = vld [vmem:[%s890_s11 + $0x10] sm:$0xff]  ;;  %v443_v56 = vld [vmem:[%s890_s11 + $0x18] sm:$0xff] }
   0xa   :  { %640 = vmatpush3.bf16.msra.mxu1 %v639_v9  ;;  %650 = vmatprep.subr.bf16.mxu0 %v678_v4  ;;  %v660_v42 = vpack.c.bf16 %v66_v41, %v65_v40  ;;  %v534_v46 = vld [vmem:[%s889_s6] ss:$0 sm:$0xff]  ;;  %v669_v57 = vpack.c.bf16 %v443_v56, %v442_v55 }
   0xb   :  { %641 = vmatprep.subr.bf16.mxu1 %v678_v4  ;;  %v440_v52 = vld [vmem:[%s890_s11] sm:$0xff] }
   0xc   :  { %v666_v54 = vpack.c.bf16 %v441_v53, %v440_v52  ;;  %v536_v58 = vld [vmem:[%s891_s8] ss:$0 sm:$0xff] }
   0xd   :  { %652 = vmatpush3.bf16.msra.mxu0 %v651_v27  ;;  %v421_v23 = vld [vmem:[%s893_s10] sm:$0x1] }
   0xe   :  { %643 = vmatpush3.bf16.msra.mxu1 %v642_v12  ;;  %653 = vmatprep.subr.bf16.mxu0 %v678_v4  ;;  %v538_v32 = vld [vmem:[%s894_s12] ss:$0 sm:$0xff] }
   0xf   :  { %644 = vmatprep.subr.bf16.mxu1 %v678_v4 }
  0x12   :  { %646 = vmatpush3.bf16.msra.mxu1 %v645_v15 }
  0x13   :  { %665 = vmatprep.subr.bf16.mxu1 %v678_v4 }
  0xd6   :  { %v150_v17 = vpop.f32.mrb[0].mxu0 }
  0xd7   :  { %v151_v18 = vadd.f32 %v529_v16, %v150_v17  ;;  %v574_v19 = vpop.f32.mrb[1].mxu0  ;;  %v425_v17 = vlaneseq }
  0xd8   :  { %v417_v19 = vld [vmem:[%s892_s9] sm:$0x1] }
  0xd9   :  { %v154_v20 = vmul.f32 0.01, %v151_v18 }
  0xdb   :  { %v155_v21 = vmax.f32 %v151_v18, %v154_v20  ;;  %v426_v18 = vshrl.u32 %v425_v17, 7 }
  0xdd   :  { %592 = vmatmul.mubr.msk.f32.vlgmr.msra.gmra.mrb[0].mxu1 %vm162_vm3, %v155_v21  ;;  %v427_v20 = vsub.s32 0, %v426_v18 }
  0xde   :  { %632 = vmatprep.mubr.msk.f32.mxu1 %vm677_vm2, %v676_v0  ;;  %667 = vmatpush3.bf16.msra.mxu1 %v666_v54 }
  0xdf   :  { %668 = vmatprep.subr.bf16.mxu1 %v678_v4 }
  0xe2   :  { %670 = vmatpush3.bf16.msra.mxu1 %v669_v57 }
 0x1b0   :  { %v232_v29 = vpop.f32.mrb[0].mxu1 }
 0x1b1   :  { %v233_v30 = vadd.f32 %v532_v28, %v232_v29  ;;  %v593_v31 = vpop.f32.mrb[1].mxu1 }
 0x1b3   :  { %v236_v34 = vmul.f32 0.01, %v233_v30 }
 0x1b5   :  { %v237_v36 = vmax.f32 %v233_v30, %v236_v34 }
 0x1b7   :  { %603 = vmatmul.mubr.msk.f32.vlgmr.msra.gmra.mrb[2].mxu0 %vm244_vm4, %v237_v36 }
 0x1b8   :  { %655 = vmatpush3.bf16.msra.mxu0 %v654_v35  ;;  %621 = vmatprep.mubr.msk.f32.mxu0 %vm677_vm2, %v676_v0 }
 0x1b9   :  { %656 = vmatprep.subr.bf16.mxu0 %v678_v4 }
 0x1bc   :  { %658 = vmatpush3.bf16.msra.mxu0 %v657_v39 }
 0x1bd   :  { %659 = vmatprep.subr.bf16.mxu0 %v678_v4 }
 0x1c0   :  { %661 = vmatpush3.bf16.msra.mxu0 %v660_v42 }
 0x1c1   :  { %662 = vmatprep.subr.bf16.mxu0 %v678_v4 }
 0x1c4   :  { %664 = vmatpush3.bf16.msra.mxu0 %v663_v45 }
 0x28a   :  { %v314_v47 = vpop.f32.mrb[2].mxu0 }
 0x28b   :  { %v315_v48 = vadd.f32 %v534_v46, %v314_v47  ;;  %v604_v49 = vpop.f32.mrb[3].mxu0 }
 0x28d   :  { %v318_v50 = vmul.f32 0.01, %v315_v48 }
 0x28f   :  { %v319_v51 = vmax.f32 %v315_v48, %v318_v50 }
 0x291   :  { %622 = vmatmul.mubr.msk.f32.vlgmr.msra.gmra.mrb[4].mxu0 %vm162_vm3, %v319_v51 }
 0x364   :  { %v395_v59 = vpop.f32.mrb[4].mxu0 }
 0x365   :  { %v396_v60 = vadd.f32 %v536_v58, %v395_v59  ;;  %v623_v61 = vpop.f32.mrb[5].mxu0 }
 0x367   :  { %v399_v62 = vsel %vm244_vm4, %v396_v60, 0.0 }
 0x368   :  { %v400_v63 = vrot.slane %v399_v62, 4 }
 0x36a   :  { %v401_v0 = vadd.f32 %v400_v63, %v399_v62 }
 0x36c   :  { %v402_v1 = vrot.slane %v401_v0, 2 }
 0x36e   :  { %v403_v2 = vadd.f32 %v402_v1, %v401_v0 }
 0x370   :  { %v404_v3 = vrot.slane %v403_v2, 1 }
 0x372   :  { %v405_v4 = vadd.f32 %v404_v3, %v403_v2 }
 0x374   :  { %v406_v5 = vmul.f32 0.125, %v405_v4 }
 0x376   :  { %v407_v6 = vsub.f32 %v396_v60, %v406_v5 }
 0x378   :  { %v408_v7 = vmul.f32 %v407_v6, %v407_v6 }
 0x37a   :  { %v409_v8 = vsel %vm244_vm4, %v408_v7, 0.0 }
 0x37b   :  { %v410_v9 = vrot.slane %v409_v8, 4 }
 0x37d   :  { %v411_v10 = vadd.f32 %v410_v9, %v409_v8 }
 0x37f   :  { %v412_v11 = vrot.slane %v411_v10, 2 }
 0x381   :  { %v413_v12 = vadd.f32 %v412_v11, %v411_v10 }
 0x383   :  { %v414_v13 = vrot.slane %v413_v12, 1 }
 0x385   :  { %v415_v14 = vadd.f32 %v414_v13, %v413_v12 }
 0x387   :  { %v416_v15 = vmul.f32 0.125, %v415_v14 }
 0x389   :  { %v418_v16 = vadd.f32 1e-05, %v416_v15 }
 0x38b   :  { %674 = vrsqrt.f32 %v418_v16 }
 0x395   :  { %v675_v21 = vpop.eup %674 }
 0x396   :  { %v420_v22 = vmul.f32 %v675_v21, %v417_v19 }
 0x398   :  { %v422_v24 = vmul.f32 %v420_v22, %v406_v5  ;;  %v428_v25 = vrot.slane %v420_v22, %v427_v20 }
 0x39a   :  { %v423_v26 = vsub.f32 %v421_v23, %v422_v24  ;;  %v430_v27 = vmul.f32 %v428_v25, %v396_v60 }
 0x39c   :  { %v435_v28 = vrot.slane %v423_v26, %v427_v20 }
 0x39e   :  { %v437_v29 = vadd.f32 %v435_v28, %v430_v27 }
 0x3a0   :  { %v438_v30 = vmul.f32 0.01, %v437_v29 }
 0x3a2   :  { %v439_v31 = vmax.f32 %v437_v29, %v438_v30 }
 0x3a4   :  { %633 = vmatmul.mubr.msk.f32.vlgmr.msra.gmra.mrb[2].mxu1 %vm244_vm4, %v439_v31 }
 0x477   :  { %v520_v33 = vpop.f32.mrb[2].mxu1 }
 0x478   :  { %v521_v34 = vadd.f32 %v538_v32, %v520_v33  ;;  %v634_v35 = vpop.f32.mrb[3].mxu1 }
 0x47a   :  { %524 = vst.msk [vmem:[%s895_s13] sm:$0xff] %vm76_vm1, %v521_v34 }

</bundles_post_ra>
